<compile_context>
chip_gen: v5e
topology: v5e:2x2
jax: 0.10.0
libtpu: 0.0.40
codegen_flags: <defaults>
</compile_context>

<pallas_src>
import functools

import jax
import jax.numpy as jnp
from jax.experimental import pallas as pl
from jax.experimental.pallas import tpu as pltpu

LANES = 128
MAX_TILE_ROWS = 2048           # 2048 x 128 f32 = 1 MiB per input buffer
NUM_CORES = 2                  # leading "parallel" axis: v7x megacore; harmless on 1-TC chips
VMEM_LIMIT_BYTES = 48 * 1024 * 1024


def _sublane_packing(dtype):
    """Sublane packing for a dtype: f32 -> 8, bf16/f16 -> 16, int8/u8 -> 32."""
    bits = dtype.itemsize * 8
    return max(8, 256 // bits)


def _combined_loss_kernel(pred_ref, target_ref, out_ref, *, alpha, gamma, tile_rows):
    """Accumulates [focal_sum, intersection, pred_sum, target_sum] per core.

    Grid = (NUM_CORES, steps).  The leading axis is "parallel" (one output
    block / accumulator set per core); the inner axis streams that core's
    row-tiles.  out_ref is a VMEM (1, 4, 8, 128) f32 block, resident across
    the inner axis (same block index for all inner steps).
    """
    i = pl.program_id(1)

    @pl.when(i == 0)
    def _init():
        out_ref[...] = jnp.zeros_like(out_ref)

    x = pred_ref[...].astype(jnp.float32)     # [tile_rows, 128] logits
    t = target_ref[...].astype(jnp.float32)   # [tile_rows, 128] targets

    # One shared exp feeds both the sigmoid and the stable BCE-with-logits term.
    e = jnp.exp(-jnp.abs(x))
    # NOTE: pl.reciprocal(1+e, approx=True) would move this to the EUP slot,
    # but its ~2^-12 relative error is borderline for the rtol=1e-4 reference
    # check, so the exact divide is kept.
    inv_1pe = 1.0 / (1.0 + e)
    p = jnp.where(x >= 0.0, inv_1pe, e * inv_1pe)            # sigmoid(x)
    bce = jnp.maximum(x, 0.0) - x * t + jnp.log1p(e)         # BCE with logits

    pt = p * t + (1.0 - p) * (1.0 - t)
    alpha_t = alpha * t + (1.0 - alpha) * (1.0 - t)
    one_m_pt = 1.0 - pt
    if float(gamma) == 2.0:
        focal_pow = one_m_pt * one_m_pt                      # avoid pow lowering
    else:
        focal_pow = one_m_pt ** gamma
    focal_elem = alpha_t * focal_pow * bce

    def vreg_sum(v):
        # Reduce over whole (8,128) vregs only -> pure VALU adds, no XLU work
        # per tile.  The final 8->1 / 128->1 reduction is done in the wrapper.
        return jnp.sum(v.reshape(tile_rows // 8, 8, LANES), axis=0)

    out_ref[0, 0] += vreg_sum(focal_elem)   # focal-loss numerator
    out_ref[0, 1] += vreg_sum(p * t)        # dice intersection
    out_ref[0, 2] += vreg_sum(p)            # sum(sigmoid(pred))
    out_ref[0, 3] += vreg_sum(t)            # sum(target)


def _partial_sums_jax(x, t, *, alpha, gamma):
    """[focal_sum, intersection, pred_sum, target_sum] for a small flat slab."""
    x = x.astype(jnp.float32)
    t = t.astype(jnp.float32)
    p = jax.nn.sigmoid(x)
    bce = jnp.maximum(x, 0.0) - x * t + jnp.log1p(jnp.exp(-jnp.abs(x)))
    pt = p * t + (1.0 - p) * (1.0 - t)
    alpha_t = alpha * t + (1.0 - alpha) * (1.0 - t)
    focal = alpha_t * (1.0 - pt) ** gamma * bce
    return jnp.stack([jnp.sum(focal), jnp.sum(p * t), jnp.sum(p), jnp.sum(t)])


def combined_loss(pred, target, *, focal_weight=1.0, dice_weight=1.0,
                  focal_alpha=0.25, focal_gamma=2.0, smooth=1.0):
    """JAX/Pallas equivalent of CombinedLoss.forward.

    pred:   [B, C, H, W] logits (any float dtype)
    target: [B, C, H, W] (or [B, H, W]) mask, any numeric dtype
    Returns (total_loss, focal_loss, dice_loss) as f32 scalars.
    """
    if target.ndim == pred.ndim - 1:
        target = target[:, None, ...]                  # torch unsqueeze(1)
    if target.shape != pred.shape:
        target = jnp.broadcast_to(target, pred.shape)
    if target.dtype == jnp.bool_:
        target = target.astype(jnp.float32)            # avoid i1 VMEM loads

    alpha = float(focal_alpha)
    gamma = float(focal_gamma)
    n = pred.size                                       # static Python int

    pred_flat = pred.reshape(-1)                        # bitcast, no copy
    target_flat = target.reshape(-1)

    packing = max(_sublane_packing(pred.dtype), _sublane_packing(target.dtype))

    rows_full = n // LANES
    lane_rem = n - rows_full * LANES
    rows_per_core = rows_full // NUM_CORES

    if rows_per_core >= packing:
        steps = max(1, pl.cdiv(rows_per_core, MAX_TILE_ROWS))
        tile_rows = (rows_per_core // steps) // packing * packing
        rows_main = NUM_CORES * steps * tile_rows
        n_main = rows_main * LANES
    else:
        steps = tile_rows = rows_main = n_main = 0      # too small: all-JAX path

    if n_main > 0:
        if lane_rem == 0:
            # Pure bitcast reshape (no data movement).  The grid only touches
            # the first rows_main rows; the trailing rows are never DMA'd and
            # are handled by the JAX tail path below.
            pred2d = pred_flat.reshape(rows_full, LANES)
            target2d = target_flat.reshape(rows_full, LANES)
        else:
            # TODO(synk): for n % 128 != 0 this prefix slice may materialize a
            # copy of the main region; a manual-DMA (pl.ANY) variant could
            # avoid it, but is not worth the complexity here.
            pred2d = jax.lax.slice(pred_flat, (0,), (n_main,)).reshape(rows_main, LANES)
            target2d = jax.lax.slice(target_flat, (0,), (n_main,)).reshape(rows_main, LANES)

        tile_spec = pl.BlockSpec((tile_rows, LANES), lambda c, i: (c * steps + i, 0))
        out_spec = pl.BlockSpec((1, 4, 8, LANES), lambda c, i: (c, 0, 0, 0))
        # TODO(synk): optionally sweep pipeline_mode=pl.Buffered(3) on the
        # input specs on v7x if the trace shows exposed DMA.

        kernel = functools.partial(_combined_loss_kernel, alpha=alpha,
                                   gamma=gamma, tile_rows=int(tile_rows))

        acc = pl.pallas_call(
            kernel,
            out_shape=jax.ShapeDtypeStruct((NUM_CORES, 4, 8, LANES), jnp.float32),
            grid=(NUM_CORES, steps),
            in_specs=[tile_spec, tile_spec],
            out_specs=out_spec,
            compiler_params=pltpu.CompilerParams(
                dimension_semantics=("parallel", "arbitrary"),
                vmem_limit_bytes=VMEM_LIMIT_BYTES),
        )(pred2d, target2d)
        main_sums = jnp.sum(acc, axis=(0, 2, 3))        # (4,) f32
    else:
        main_sums = jnp.zeros((4,), jnp.float32)

    if n_main < n:
        # Small ragged tail (row/lane remainders), fused by XLA; merged with
        # the kernel's partial sums instead of padding the whole tensor.
        tail_sums = _partial_sums_jax(pred_flat[n_main:], target_flat[n_main:],
                                      alpha=alpha, gamma=gamma)
        sums = main_sums + tail_sums
    else:
        sums = main_sums

    focal_sum, intersection, pred_sum, target_sum = sums[0], sums[1], sums[2], sums[3]
    focal = focal_sum / jnp.float32(n)                  # reduction='mean'
    dice = (2.0 * intersection + smooth) / (pred_sum + target_sum + smooth)
    dice_loss = 1.0 - dice
    total = focal_weight * focal + dice_weight * dice_loss
    return total, focal, dice_loss


def _reference_combined_loss(pred, target, *, focal_weight=1.0, dice_weight=1.0,
                             focal_alpha=0.25, focal_gamma=2.0, smooth=1.0):
    """Pure-JAX reference mirroring the PyTorch module, for a sanity check."""
    x = pred.astype(jnp.float32)
    t = target.astype(jnp.float32)
    p = jax.nn.sigmoid(x)
    bce = jnp.maximum(x, 0.0) - x * t + jnp.log1p(jnp.exp(-jnp.abs(x)))
    pt = p * t + (1 - p) * (1 - t)
    alpha_t = focal_alpha * t + (1 - focal_alpha) * (1 - t)
    focal = jnp.mean(alpha_t * (1 - pt) ** focal_gamma * bce)
    inter = jnp.sum(p * t)
    dice = (2 * inter + smooth) / (jnp.sum(p) + jnp.sum(t) + smooth)
    dice_loss = 1.0 - dice
    return focal_weight * focal + dice_weight * dice_loss, focal, dice_loss


def _check(pred, target):
    got = combined_loss(pred, target)
    jax.block_until_ready(got)
    ref = _reference_combined_loss(pred, target)
    for g, r in zip(got, ref):
        assert jnp.allclose(g, r, rtol=1e-4, atol=1e-6), (g, r)


if __name__ == "__main__":
    key = jax.random.PRNGKey(0)
    k1, k2, k3, k4 = jax.random.split(key, 4)

    # Main test: shape implied by the module (grid divides exactly, no tail).
    B, C, H, W = 2, 4, 16, 16
    pred = jax.random.normal(k1, (B, C, H, W), dtype=jnp.float32) * 2.0
    target = jax.random.bernoulli(k2, p=0.3, shape=(B, C, H, W)).astype(jnp.float32)
    _check(pred, target)

    # Ragged test: exercises kernel main region + plain-JAX tail merge.
    B2, C2, H2, W2 = 2, 3, 24, 24
    pred2 = jax.random.normal(k3, (B2, C2, H2, W2), dtype=jnp.float32) * 2.0
    target2 = jax.random.bernoulli(k4, p=0.3, shape=(B2, C2, H2, W2)).astype(jnp.float32)
    _check(pred2, target2)

    print("KERNEL_OK")
</pallas_src>

<mosaic_0001>
module attributes {stable_mosaic.version = 11 : i64} {
  func.func @_combined_loss_kernel(%arg0: i32, %arg1: i32, %arg2: memref<8x128xf32, #tpu.memory_space<vmem>>, %arg3: memref<8x128xf32, #tpu.memory_space<vmem>>, %arg4: memref<1x4x8x128xf32, #tpu.memory_space<vmem>>) attributes {dimension_semantics = [#tpu.dimension_semantics<parallel>, #tpu.dimension_semantics<arbitrary>], iteration_bounds = array<i64: 2, 1>, scalar_prefetch = 0 : i64, scratch_operands = 0 : i64, tpu.core_type = #tpu.core_type<tc>, window_params = [{transform_indices = @transform_0, window_bounds = array<i64: 8, 128>}, {transform_indices = @transform_1, window_bounds = array<i64: 8, 128>}, {transform_indices = @transform_2, window_bounds = array<i64: 1, 4, 8, 128>}]} {
    %c0_i32 = arith.constant 0 : i32
    %0 = arith.cmpi eq, %arg1, %c0_i32 : i32
    %1 = arith.extui %0 : i1 to i32
    %c0_i32_0 = arith.constant 0 : i32
    %2 = arith.cmpi ne, %1, %c0_i32_0 : i32
    scf.if %2 {
      %cst_47 = arith.constant 0.000000e+00 : f32
      %75 = vector.broadcast %cst_47 : f32 to vector<1x4x8x128xf32>
      %c0_48 = arith.constant 0 : index
      %c0_49 = arith.constant 0 : index
      %c0_50 = arith.constant 0 : index
      %c0_51 = arith.constant 0 : index
      %76 = vector.load %arg4[%c0_48, %c0_49, %c0_50, %c0_51] : memref<1x4x8x128xf32, #tpu.memory_space<vmem>>, vector<1x4x8x128xf32>
      tpu.vector_store %arg4[%c0_48, %c0_49, %c0_50, %c0_51], %75 {strides = array<i32>} : memref<1x4x8x128xf32, #tpu.memory_space<vmem>>, vector<1x4x8x128xf32>,
    } else {
    }
    %c0 = arith.constant 0 : index
    %c0_1 = arith.constant 0 : index
    %3 = vector.load %arg2[%c0, %c0_1] : memref<8x128xf32, #tpu.memory_space<vmem>>, vector<8x128xf32>
    %c0_2 = arith.constant 0 : index
    %c0_3 = arith.constant 0 : index
    %4 = vector.load %arg3[%c0_2, %c0_3] : memref<8x128xf32, #tpu.memory_space<vmem>>, vector<8x128xf32>
    %5 = math.absf %3 : vector<8x128xf32>
    %cst = arith.constant 0.000000e+00 : f32
    %6 = vector.broadcast %cst : f32 to vector<8x128xf32>
    %7 = arith.subf %6, %5 : vector<8x128xf32>
    %8 = math.exp %7 : vector<8x128xf32>
    %cst_4 = arith.constant 1.000000e+00 : f32
    %9 = vector.broadcast %cst_4 : f32 to vector<8x128xf32>
    %10 = arith.addf %9, %8 : vector<8x128xf32>
    %cst_5 = arith.constant 1.000000e+00 : f32
    %11 = vector.broadcast %cst_5 : f32 to vector<8x128xf32>
    %12 = arith.divf %11, %10 : vector<8x128xf32>
    %cst_6 = arith.constant 0.000000e+00 : f32
    %13 = vector.broadcast %cst_6 : f32 to vector<8x128xf32>
    %14 = arith.cmpf oge, %3, %13 : vector<8x128xf32>
    %15 = arith.mulf %8, %12 : vector<8x128xf32>
    %16 = arith.select %14, %12, %15 : vector<8x128xi1>, vector<8x128xf32>
    %cst_7 = arith.constant 0.000000e+00 : f32
    %17 = vector.broadcast %cst_7 : f32 to vector<8x128xf32>
    %18 = arith.maximumf %3, %17 : vector<8x128xf32>
    %19 = arith.mulf %3, %4 : vector<8x128xf32>
    %20 = arith.subf %18, %19 : vector<8x128xf32>
    %21 = math.log1p %8 : vector<8x128xf32>
    %22 = arith.addf %20, %21 : vector<8x128xf32>
    %23 = arith.mulf %16, %4 : vector<8x128xf32>
    %cst_8 = arith.constant 1.000000e+00 : f32
    %24 = vector.broadcast %cst_8 : f32 to vector<8x128xf32>
    %25 = arith.subf %24, %16 : vector<8x128xf32>
    %cst_9 = arith.constant 1.000000e+00 : f32
    %26 = vector.broadcast %cst_9 : f32 to vector<8x128xf32>
    %27 = arith.subf %26, %4 : vector<8x128xf32>
    %28 = arith.mulf %25, %27 : vector<8x128xf32>
    %29 = arith.addf %23, %28 : vector<8x128xf32>
    %cst_10 = arith.constant 2.500000e-01 : f32
    %30 = vector.broadcast %cst_10 : f32 to vector<8x128xf32>
    %31 = arith.mulf %30, %4 : vector<8x128xf32>
    %cst_11 = arith.constant 1.000000e+00 : f32
    %32 = vector.broadcast %cst_11 : f32 to vector<8x128xf32>
    %33 = arith.subf %32, %4 : vector<8x128xf32>
    %cst_12 = arith.constant 7.500000e-01 : f32
    %34 = vector.broadcast %cst_12 : f32 to vector<8x128xf32>
    %35 = arith.mulf %34, %33 : vector<8x128xf32>
    %36 = arith.addf %31, %35 : vector<8x128xf32>
    %cst_13 = arith.constant 1.000000e+00 : f32
    %37 = vector.broadcast %cst_13 : f32 to vector<8x128xf32>
    %38 = arith.subf %37, %29 : vector<8x128xf32>
    %39 = arith.mulf %38, %38 : vector<8x128xf32>
    %40 = arith.mulf %36, %39 : vector<8x128xf32>
    %41 = arith.mulf %40, %22 : vector<8x128xf32>
    %c0_14 = arith.constant 0 : index
    %c0_15 = arith.constant 0 : index
    %c0_16 = arith.constant 0 : index
    %c0_17 = arith.constant 0 : index
    %42 = vector.load %arg4[%c0_14, %c0_15, %c0_16, %c0_17] : memref<1x4x8x128xf32, #tpu.memory_space<vmem>>, vector<1x1x8x128xf32>
    %43 = vector.shape_cast %42 : vector<1x1x8x128xf32> to vector<8x128xf32>
    %44 = vector.shape_cast %41 : vector<8x128xf32> to vector<1x8x128xf32>
    %cst_18 = arith.constant dense<0.000000e+00> : vector<8x128xf32>
    %45 = vector.multi_reduction <add>, %44, %cst_18 [0] : vector<1x8x128xf32> to vector<8x128xf32>
    %46 = arith.addf %43, %45 : vector<8x128xf32>
    %c0_19 = arith.constant 0 : index
    %c0_20 = arith.constant 0 : index
    %c0_21 = arith.constant 0 : index
    %c0_22 = arith.constant 0 : index
    %47 = vector.load %arg4[%c0_19, %c0_20, %c0_21, %c0_22] : memref<1x4x8x128xf32, #tpu.memory_space<vmem>>, vector<1x1x8x128xf32>
    %48 = vector.shape_cast %47 : vector<1x1x8x128xf32> to vector<8x128xf32>
    %49 = vector.shape_cast %46 : vector<8x128xf32> to vector<1x1x8x128xf32>
    tpu.vector_store %arg4[%c0_19, %c0_20, %c0_21, %c0_22], %49 {strides = array<i32>} : memref<1x4x8x128xf32, #tpu.memory_space<vmem>>, vector<1x1x8x128xf32>,
    %c0_23 = arith.constant 0 : index
    %c1 = arith.constant 1 : index
    %c0_24 = arith.constant 0 : index
    %c0_25 = arith.constant 0 : index
    %50 = vector.load %arg4[%c0_23, %c1, %c0_24, %c0_25] : memref<1x4x8x128xf32, #tpu.memory_space<vmem>>, vector<1x1x8x128xf32>
    %51 = vector.shape_cast %50 : vector<1x1x8x128xf32> to vector<8x128xf32>
    %52 = arith.mulf %16, %4 : vector<8x128xf32>
    %53 = vector.shape_cast %52 : vector<8x128xf32> to vector<1x8x128xf32>
    %cst_26 = arith.constant dense<0.000000e+00> : vector<8x128xf32>
    %54 = vector.multi_reduction <add>, %53, %cst_26 [0] : vector<1x8x128xf32> to vector<8x128xf32>
    %55 = arith.addf %51, %54 : vector<8x128xf32>
    %c0_27 = arith.constant 0 : index
    %c1_28 = arith.constant 1 : index
    %c0_29 = arith.constant 0 : index
    %c0_30 = arith.constant 0 : index
    %56 = vector.load %arg4[%c0_27, %c1_28, %c0_29, %c0_30] : memref<1x4x8x128xf32, #tpu.memory_space<vmem>>, vector<1x1x8x128xf32>
    %57 = vector.shape_cast %56 : vector<1x1x8x128xf32> to vector<8x128xf32>
    %58 = vector.shape_cast %55 : vector<8x128xf32> to vector<1x1x8x128xf32>
    tpu.vector_store %arg4[%c0_27, %c1_28, %c0_29, %c0_30], %58 {strides = array<i32>} : memref<1x4x8x128xf32, #tpu.memory_space<vmem>>, vector<1x1x8x128xf32>,
    %c0_31 = arith.constant 0 : index
    %c2 = arith.constant 2 : index
    %c0_32 = arith.constant 0 : index
    %c0_33 = arith.constant 0 : index
    %59 = vector.load %arg4[%c0_31, %c2, %c0_32, %c0_33] : memref<1x4x8x128xf32, #tpu.memory_space<vmem>>, vector<1x1x8x128xf32>
    %60 = vector.shape_cast %59 : vector<1x1x8x128xf32> to vector<8x128xf32>
    %61 = vector.shape_cast %16 : vector<8x128xf32> to vector<1x8x128xf32>
    %cst_34 = arith.constant dense<0.000000e+00> : vector<8x128xf32>
    %62 = vector.multi_reduction <add>, %61, %cst_34 [0] : vector<1x8x128xf32> to vector<8x128xf32>
    %63 = arith.addf %60, %62 : vector<8x128xf32>
    %c0_35 = arith.constant 0 : index
    %c2_36 = arith.constant 2 : index
    %c0_37 = arith.constant 0 : index
    %c0_38 = arith.constant 0 : index
    %64 = vector.load %arg4[%c0_35, %c2_36, %c0_37, %c0_38] : memref<1x4x8x128xf32, #tpu.memory_space<vmem>>, vector<1x1x8x128xf32>
    %65 = vector.shape_cast %64 : vector<1x1x8x128xf32> to vector<8x128xf32>
    %66 = vector.shape_cast %63 : vector<8x128xf32> to vector<1x1x8x128xf32>
    tpu.vector_store %arg4[%c0_35, %c2_36, %c0_37, %c0_38], %66 {strides = array<i32>} : memref<1x4x8x128xf32, #tpu.memory_space<vmem>>, vector<1x1x8x128xf32>,
    %c0_39 = arith.constant 0 : index
    %c3 = arith.constant 3 : index
    %c0_40 = arith.constant 0 : index
    %c0_41 = arith.constant 0 : index
    %67 = vector.load %arg4[%c0_39, %c3, %c0_40, %c0_41] : memref<1x4x8x128xf32, #tpu.memory_space<vmem>>, vector<1x1x8x128xf32>
    %68 = vector.shape_cast %67 : vector<1x1x8x128xf32> to vector<8x128xf32>
    %69 = vector.shape_cast %4 : vector<8x128xf32> to vector<1x8x128xf32>
    %cst_42 = arith.constant dense<0.000000e+00> : vector<8x128xf32>
    %70 = vector.multi_reduction <add>, %69, %cst_42 [0] : vector<1x8x128xf32> to vector<8x128xf32>
    %71 = arith.addf %68, %70 : vector<8x128xf32>
    %c0_43 = arith.constant 0 : index
    %c3_44 = arith.constant 3 : index
    %c0_45 = arith.constant 0 : index
    %c0_46 = arith.constant 0 : index
    %72 = vector.load %arg4[%c0_43, %c3_44, %c0_45, %c0_46] : memref<1x4x8x128xf32, #tpu.memory_space<vmem>>, vector<1x1x8x128xf32>
    %73 = vector.shape_cast %72 : vector<1x1x8x128xf32> to vector<8x128xf32>
    %74 = vector.shape_cast %71 : vector<8x128xf32> to vector<1x1x8x128xf32>
    tpu.vector_store %arg4[%c0_43, %c3_44, %c0_45, %c0_46], %74 {strides = array<i32>} : memref<1x4x8x128xf32, #tpu.memory_space<vmem>>, vector<1x1x8x128xf32>,
    return
  }
  func.func @transform_0(%arg0: i32, %arg1: i32) -> (i32, i32) {
    %c1_i32 = arith.constant 1 : i32
    %0 = arith.muli %arg0, %c1_i32 : i32
    %1 = arith.addi %0, %arg1 : i32
    %c0_i32 = arith.constant 0 : i32
    %c0_i32_0 = arith.constant 0 : i32
    return %1, %c0_i32 : i32, i32
  }
  func.func @transform_1(%arg0: i32, %arg1: i32) -> (i32, i32) {
    %c1_i32 = arith.constant 1 : i32
    %0 = arith.muli %arg0, %c1_i32 : i32
    %1 = arith.addi %0, %arg1 : i32
    %c0_i32 = arith.constant 0 : i32
    %c0_i32_0 = arith.constant 0 : i32
    return %1, %c0_i32 : i32, i32
  }
  func.func @transform_2(%arg0: i32, %arg1: i32) -> (i32, i32, i32, i32) {
    %c0_i32 = arith.constant 0 : i32
    %c0_i32_0 = arith.constant 0 : i32
    %c0_i32_1 = arith.constant 0 : i32
    %c0_i32_2 = arith.constant 0 : i32
    return %arg0, %c0_i32, %c0_i32_0, %c0_i32_1 : i32, i32, i32, i32
  }
}

</mosaic_0001>

<bundles_post_ra>
// kernel: tpu_custom_call.1
= control target key start
LH: loop header
LB: loop body
LE: loop exit
PB: predicated region body
PF: predicated region fallthrough
CT: control target
= control target key end

     0   :  { %7 = vsyncpa [#allocation3], 0  ;;  %s820_s0 = inlined_call_operand.hbm [shape: f32[16,128], index: 0, kind: input, shape index: {}]   ;;  %s821_s1 = inlined_call_operand.hbm [shape: f32[16,128], index: 1, kind: input, shape index: {}]   ;;  %s822_s2 = inlined_call_operand.hbm [shape: f32[2,4,8,128], index: 2, kind: output, shape index: {}]  }
   0x1   :  { %9 = vsyncpa [#allocation3 + $0x1], 0 }
   0x2   :  { %10 = vsyncpa [#allocation6], 0 }
   0x3   :  { %12 = vsyncpa [#allocation6 + $0x1], 0 }
   0x4   :  { %13 = vsyncpa [#allocation4], 0 }
   0x5   :  { %15 = vsyncpa [#allocation4 + $0x1], 0  ;;  %s684_s9 = smov 0   ;;  %s686_s10 = smov 0  }
   0x6   :  { %s688_s11 = smov 0   ;;  %s690_s12 = smov 0  }
   0x7   :  { %s692_s13 = smov 0   ;;  %s694_s14 = smov 0  }
   0x8 LB: > { %s419_s15 = sadd.s32 4294967295, %s665_s14   ;;  %s420_s16 = sadd.s32 4294967294, %s665_s14   ;;  %s665_s14 = sphi %s694_s14, %s21_s14   ;;  %s661_s13 = sphi %s692_s13, %s831_s13   ;;  %s657_s12 = sphi %s690_s12, %s830_s12   ;;  %s653_s11 = sphi %s688_s11, %s829_s11   ;;  %s649_s10 = sphi %s686_s10, %s828_s10   ;;  %s645_s9 = sphi %s684_s9, %s827_s9  }
   0x9   : > { %s33_s17 = sadd.s32 1, %s661_s13  ;;  %s42_s18 = sadd.s32 1, %s653_s11 }
   0xa   : > { %p35_p0 = scmp.ge.s32.totalorder %s33_s17, 2  ;;  %p49_p1 = scmp.ne.s32.totalorder %s653_s11, %s649_s10 }
   0xb   : > { %p50_p2 = scmp.eq.s32.totalorder %s665_s14, 0  ;;  %p55_p3 = scmp.ne.s32.totalorder %s649_s10, %s645_s9 }
   0xc   : > { %s833_s17 = smov (%p35_p0, %s33_s17), 0  ;;  %p56_p5 = scmp.eq.s32.totalorder %s419_s15, 0 }
   0xd   : > { %p725_p4 = por %p50_p2, %p49_p1  ;;  %s39_s20 = ssub.s32 %s661_s13, %s833_s17 }
   0xe   : > { %p107_p6 = scmp.eq.s32.totalorder %s419_s15, 1  ;;  %p40_p7 = scmp.eq.s32.totalorder %s39_s20, 0 }
   0xf   : > { %p731_p8 = por %p56_p5, %p55_p3  ;;  %p113_p10 = scmp.eq.s32.totalorder %s420_s16, 1 }
  0x10   : > { %p735_p9 = por %p107_p6, %p49_p1  ;;  %p422_p12 = scmp.ge.s32.totalorder %s665_s14, 2 }
  0x11   : > { %s740_s23 = scalar_select %p40_p7, %s653_s11, %s42_s18  }
  0x12   : > { %p742_p11 = por %p113_p10, %p55_p3  ;;  %p460_p13 = scmp.lt.s32.totalorder %s665_s14, 2 }
  0x13   : > { %s133_s25 = sand.u32 1, %s653_s11   ;;  %s424_s27 = sshll.u32 %s661_s13, 3 }
  0x14   : > { %s423_s26 = sshll.u32 %s133_s25, 3  ;;  %s142_s30 = scalar_lea.hbm %s820_s0, %s424_s27 }
  0x15   : > { %s137_s3 = scalar_lea.vmem [#allocation2], %s423_s26  ;;  %s144_s5 = sshll.u32 %s142_s30, 4  ;;  %s145_s5 = int_to_ptr.hbm [resolvable:$true] %s144_s5 }
  0x16   : > { %s146_s4 = sshll.u32 %s137_s3, 4  ;;  %p450_p0 = pnand %p460_p13, %p725_p4  ;;  %s147_s4 = int_to_ptr.vmem [resolvable:$true] %s146_s4 }
  0x17   : > { %p427_p1 = scmp.ge.s32.totalorder %s665_s14, 1  ;;  %p171_p2 = scmp.lt.s32.totalorder %s665_s14, 3 }
  0x18   : > { %s134_s6 = scalar_lea.sflag [#allocation3], %s133_s25  ;;  %s162_s15 = scalar_lea.hbm %s821_s1, %s424_s27 }
  0x19   : > { %452 = dma.hbm_to_vmem [thread:$0]  (!%p450_p0), %s145_s5, 128, %s147_s4, %s134_s6  }
  0x1a   : > { %p172_p3 = pnand %p427_p1, %p171_p2  ;;  %s157_s16 = scalar_lea.vmem [#allocation5], %s423_s26 }
  0x1b   : > { %s166_s18 = sshll.u32 %s157_s16, 4  ;;  %s164_s20 = sshll.u32 %s162_s15, 4  ;;  %s167_s18 = int_to_ptr.vmem [resolvable:$true] %s166_s18  ;;  %s165_s20 = int_to_ptr.hbm [resolvable:$true] %s164_s20 }
  0x1c   : > { %s154_s28 = scalar_lea.sflag [#allocation6], %s133_s25  ;;  %175 = sbr.rel (%p172_p3) target bundleno = 90 (0x5a), region = 28 }
  0x1d   : > { %455 = dma.hbm_to_vmem [thread:$0]  (!%p450_p0), %s165_s20, 128, %s167_s18, %s154_s28  }
  0x1e   : > { %s761_s19 = sand.u32 (!%p172_p3), 1, %s649_s10  }
  0x1f   : > { %s428_s29 = sshll.u32 (!%p172_p3), %s761_s19, 3  ;;  %s178_s30 = scalar_lea.sflag (!%p172_p3), [#allocation3], %s761_s19 }
  0x20   : > { %s181_s3 = scalar_lea.vmem (!%p172_p3), [#allocation2], %s428_s29 }
  0x21   : > { %632 = dma.done.wait (%p731_p8), %s178_s30, 128  }
  0x22   : > { %634 = vsyncadd (%p731_p8), %s178_s30, 4294967168  ;;  %s188_s26 = scalar_lea.sflag [#allocation6], %s761_s19  ;;  %s191_s25 = scalar_lea.vmem [#allocation5], %s428_s29 }
  0x23   : > { %636 = dma.done.wait (%p731_p8), %s188_s26, 128  }
  0x24   : > { %638 = vsyncadd (%p731_p8), %s188_s26, 4294967168  ;;  %v228_v0 = vld [vmem:[%s181_s3] sm:$0xff]  ;;  %s430_s27 = sshll.u32 %s761_s19, 5  ;;  %v229_v6 = vld [vmem:[%s191_s25] sm:$0xff]  ;;  %s442_s21 = sshll.u32 %s657_s12, 5 }
  0x25   : > { %v230_v1 = vand.u32 2147483647, %v228_v0  ;;  %s775_s4 = scalar_lea.vmem [#allocation7], %s430_s27  ;;  %vm250_vm4 = vcmp.ge.f32.partialorder %v228_v0, 0.0  ;;  %v268_v22 = vsub.f32 1.0, %v229_v6  ;;  %v253_v24 = vmax.f32 %v228_v0, 0.0  ;;  %s309_s7 = scalar_lea.hbm %s822_s2, %s442_s21 }
  0x26   : > { %436 = vst [vmem:[%s775_s4 + $0x18] sm:$0xff] %v229_v6  ;;  %v254_v25 = vmul.f32 %v229_v6, %v228_v0  ;;  %v271_v30 = vmul.f32 0.25, %v229_v6  ;;  %s310_s8 = sshll.u32 %s775_s4, 4  ;;  %s312_s15 = sshll.u32 %s309_s7, 4  ;;  %s311_s8 = int_to_ptr.vmem [resolvable:$true] %s310_s8  ;;  %s313_s15 = int_to_ptr.hbm [resolvable:$true] %s312_s15 }
  0x27   : > { %v231_v2 = vsub.f32 0.0, %v230_v1  ;;  %v272_v32 = vmul.f32 0.75, %v268_v22  ;;  %s298_s16 = scalar_lea.sflag [#allocation4], %s761_s19  ;;  %s593_s18 = sshra.s32 %s313_s15, 4  ;;  %s594_s18 = int_to_ptr.hbm [resolvable:$true] %s593_s18 }
  0x28   : > { %v255_v33 = vsub.f32 %v253_v24, %v254_v25  ;;  %s595_s12 = scalar_lea.hbm %s594_s18, 32  ;;  %s599_s29 = scalar_lea.hbm %s822_s2, 64 }
  0x29   : > { %v232_v3 = vmul.f32 1.442695, %v231_v2  ;;  %v273_v36 = vadd.f32 %v272_v32, %v271_v30  ;;  %p596_p4 = scmp.ne.s32.totalorder %s594_s18, %s595_s12  ;;  %p600_p7 = scmp.lt.s32.totalorder %s594_s18, %s822_s2 }
  0x2a   : > { %p601_p8 = scmp.lt.s32.totalorder %s599_s29, %s595_s12 }
  0x2b   : > { %513 = vpow2.f32 %v232_v3  ;;  %p597_p5 = pnand %p596_p4, %p735_p9 }
  0x2c   : > { %p602_p10 = por %p601_p8, %p600_p7 }
  0x2d   : > { %p598_p6 = pneg %p597_p5 }
  0x2f   : > { %p603_p13 = pnand %p602_p10, %p598_p6 }
  0x31   : > { %v514_v4 = vpop.eup %513 }
  0x32   : > { %v234_v5 = vadd.f32 1.0, %v514_v4  ;;  %v259_v15 = vmul.f32 -0.5, %v514_v4  ;;  %v262_v21 = vand.u32 2147483647, %v514_v4 }
  0x34   : > { %515 = vrcp.f32 %v234_v5  ;;  %v246_v9 = vand.u32 2147483648, %v234_v5  ;;  %vm240_vm0 = vweird.f32 %v234_v5  ;;  %v244_v11 = vand.u32 2147483647, %v234_v5 }
  0x35   : > { %517 = vlog2.f32 %v234_v5  ;;  %v260_v19 = vadd.f32 1.0, %v259_v15  ;;  %vm263_vm5 = vcmp.lt.f32.partialorder %v262_v21, 0.0004427343 }
  0x36   : > { %v247_v13 = vor.u32 1.1754944e-38, %v246_v9  ;;  %vm245_vm3 = vcmp.eq.f32.partialorder %v244_v11, 8.507059e+37 }
  0x37   : > { %v261_v29 = vmul.f32 %v514_v4, %v260_v19 }
  0x3a   : > { %v516_v7 = vpop.eup %515 }
  0x3b   : > { %v236_v8 = vmul.f32 %v516_v7, %v234_v5  ;;  %vm241_vm1 = vweird.f32 %v516_v7  ;;  %v518_v20 = vpop.eup %517 }
  0x3c   : > { %vm242_vm2 = vmor %vm240_vm0, %vm241_vm1  ;;  %v258_v28 = vmul.f32 0.6931472, %v518_v20 }
  0x3d   : > { %v237_v10 = vsub.f32 1.0, %v236_v8 }
  0x3e   : > { %v264_v35 = vsel %vm263_vm5, %v261_v29, %v258_v28 }
  0x3f   : > { %v238_v12 = vmul.f32 %v516_v7, %v237_v10  ;;  %v265_v38 = vadd.f32 %v264_v35, %v255_v33 }
  0x41   : > { %v239_v14 = vadd.f32 %v516_v7, %v238_v12 }
  0x43   : > { %v243_v16 = vsel %vm242_vm2, %v516_v7, %v239_v14 }
  0x44   : > { %v248_v17 = vsel %vm245_vm3, %v247_v13, %v243_v16 }
  0x45   : > { %v251_v18 = vmul.f32 %v514_v4, %v248_v17 }
  0x47   : > { %v252_v23 = vsel %vm250_vm4, %v248_v17, %v251_v18 }
  0x48   : > { %v266_v26 = vmul.f32 %v252_v23, %v229_v6  ;;  %v267_v27 = vsub.f32 1.0, %v252_v23  ;;  %434 = vst [vmem:[%s775_s4 + $0x10] sm:$0xff] %v252_v23 }
  0x4a   : > { %v269_v31 = vmul.f32 %v268_v22, %v267_v27  ;;  %432 = vst [vmem:[%s775_s4 + $0x8] sm:$0xff] %v266_v26 }
  0x4c   : > { %v270_v34 = vadd.f32 %v269_v31, %v266_v26 }
  0x4e   : > { %v274_v37 = vsub.f32 1.0, %v270_v34 }
  0x50   : > { %v275_v39 = vmul.f32 %v274_v37, %v274_v37 }
  0x52   : > { %v276_v40 = vmul.f32 %v275_v39, %v273_v36 }
  0x54   : > { %v277_v41 = vmul.f32 %v276_v40, %v265_v38 }
  0x56   : > { %281 = vst [vmem:[%s775_s4] sm:$0xff] %v277_v41 }
  0x57   : > { %606 = shalt.err (!%p603_p13)
}
  0x58   : > { %s667_s19 = smov 128   ;;  %s668_s26 = smov 8  }
  0x59   : > { %447 = dma.vmem_to_hbm [thread:$0]  (%p735_p9), %s311_s8, 512, %s313_s15, %s298_s16, %s667_s19, %s667_s19, %s668_s26  }
  0x5a PF: > { %s327_s25 = sand.u32 1, %s645_s9   ;;  %p457_p0 = pnand %p422_p12, %p742_p11 }
  0x5b   : > { %s328_s27 = scalar_lea.sflag [#allocation4], %s327_s25 }
  0x5c   : > { %p458_p1 = pneg %p457_p0 }
  0x5e   : > { %640 = dma.done.wait (%p458_p1), %s328_s27, 512  }
  0x5f   : > { %642 = vsyncadd (%p458_p1), %s328_s27, 4294966784  ;;  %s21_s14 = sadd.s32 1, %s665_s14   ;;  %s827_s9 = smov %s649_s10 }
  0x60   : > { %p18_p2 = scmp.ge.s32.totalorder %s21_s14, 4   ;;  %s828_s10 = smov %s653_s11 }
  0x61   : > { %s829_s11 = smov %s740_s23  ;;  %s830_s12 = smov %s661_s13 }
  0x62   : > { %s831_s13 = smov %s833_s17  ;;  %20 = sbr.rel (!%p18_p2) target bundleno = 8 (0x8), region = 93 }
  0x67   :  { %334 = vsyncpa [#allocation3], 1 }
  0x68   :  { %336 = vsyncpa [#allocation3 + $0x1], 1 }
  0x69   :  { %337 = vsyncpa [#allocation6], 1 }
  0x6a   :  { %339 = vsyncpa [#allocation6 + $0x1], 1 }
  0x6b   :  { %340 = vsyncpa [#allocation4], 1 }
  0x6c   :  { %342 = vsyncpa [#allocation4 + $0x1], 1 }

</bundles_post_ra>
